<compile_context>
chip_gen: v5e
topology: v5e:2x2
jax: 0.10.0
libtpu: 0.0.40
codegen_flags: <defaults>
</compile_context>

<pallas_src>
import functools
import math

import numpy as np

import jax
import jax.numpy as jnp
from jax import lax
from jax.experimental import pallas as pl
from jax.experimental.pallas import tpu as pltpu


# ----------------------------------------------------------------------------
# Nearest-neighbour source indices (trace-time constants, numpy)
# ----------------------------------------------------------------------------
def _nearest_src_indices(in_size, out_size, scale=None):
    """PyTorch-compatible 'nearest' source indices.

    size path:          src = floor(dst * in / out)
    scale_factor path:  src = floor(dst / scale)   (no recompute_scale_factor)
    Both clamped to in_size - 1.
    """
    dst = np.arange(out_size)
    if scale is not None:
        src = np.floor(dst / float(scale)).astype(np.int64)
    else:
        src = (dst * in_size) // out_size
    return np.minimum(src, in_size - 1)


# ----------------------------------------------------------------------------
# Generation-aware plane blocking
# ----------------------------------------------------------------------------
def _plane_blocking(nc, h, w, h_out, w_out):
    """Choose P (planes fused per grid step) and a VMEM limit for the current TPU generation."""
    try:
        cap = getattr(pltpu.get_tpu_info(), "vmem_capacity_bytes", None)
    except Exception:  # not on TPU / interpret mode
        cap = None
    if not cap:
        cap = 64 * 1024 * 1024                            # conservative (v7x-like) default
    small_vmem = cap <= 80 * 1024 * 1024                  # v7x: 64 MiB per TC, 2 TCs
    vmem_limit = (32 if small_vmem else 64) * 1024 * 1024  # raise limit on 128 MiB parts
    min_steps = 4 if small_vmem else 2                    # >=2 steps per TC on megacore

    # Bytes per grid step, per fused plane (f32 unless noted):
    resident = 2 * 2 * (h_out * h + w * w_out)            # bf16 R + C, x2 possible buffers
    per_plane_io = 4 * 2 * (h * w + h_out * w_out)        # re+im, in+out (single buffer)
    per_plane_scr = 4 * h * w_out                         # column-expanded intermediate
    per_plane_tmp = 6 * h * w + 4 * h * w_out             # bf16 split parts + live matmul result
    budget = vmem_limit - resident - (2 << 20)            # slack for spills / compiler temps

    def aligned(c):  # (8, 128)-style rule on the sublane dim of the 2-D blocks
        return c == nc or ((c * h) % 8 == 0 and (c * h_out) % 8 == 0)

    def need(c):     # in/out blocks double-buffered by the pipeline
        return c * (2 * per_plane_io + per_plane_scr + per_plane_tmp)

    choices = [c for c in range(1, nc + 1) if nc % c == 0 and aligned(c)]
    best = None
    for c in choices:                                     # ascending; later wins if valid
        if need(c) > budget:
            continue
        if best is None or nc // c >= min_steps:
            best = c
    if best is None:
        # Nothing fits the budget: take the smallest aligned block and raise the limit.
        # TODO(synk): H-tile instead of bumping the limit once planes get this large.
        best = choices[0]
        vmem_limit = min(cap, need(best) + resident + (4 << 20))
    return best, int(vmem_limit)


# ----------------------------------------------------------------------------
# Exact one-hot matmuls (3 bf16 MXU passes, bit-exact for finite f32 data)
# ----------------------------------------------------------------------------
def _split3_bf16(x):
    """Exact 3-way bf16 decomposition of f32 data: x == p0 + p1 + p2 (all casts/subtracts exact)."""
    p0 = x.astype(jnp.bfloat16)
    r1 = x - p0.astype(jnp.float32)
    p1 = r1.astype(jnp.bfloat16)
    r2 = r1 - p1.astype(jnp.float32)
    p2 = r2.astype(jnp.bfloat16)
    return p0, p1, p2


def _sel_dot(lhs, rhs, split):
    """lhs @ rhs where the operand named by `split` ('lhs'/'rhs') is f32 data that must pass
    through bit-exactly; the other operand is a 0/1 selection matrix already stored in bf16."""
    data = lhs if split == "lhs" else rhs
    acc = None
    for part in _split3_bf16(data):
        a = part if split == "lhs" else lhs
        b = rhs if split == "lhs" else part
        d = jnp.dot(a, b, preferred_element_type=jnp.float32)   # 1 bf16 MXU pass, f32 accumulate
        acc = d if acc is None else acc + d
    return acc


# ----------------------------------------------------------------------------
# Kernel
# ----------------------------------------------------------------------------
def _make_upsample_kernel(p, h, h_out):
    def kernel(xr_ref, xi_ref, r_ref, c_ref, or_ref, oi_ref, t_ref):
        # xr/xi : (P*H, W)         real / imag plane blocks (planes stacked along rows)
        # r     : (H_out, H) bf16  one-hot row selection
        # c     : (W, W_out) bf16  one-hot column selection
        # or/oi : (P*H_out, W_out)
        # t     : (P*H, W_out) f32 VMEM scratch (column-expanded intermediate)
        r = r_ref[...]
        c = c_ref[...]

        def expand(x_ref, o_ref):
            # Column (lane) expansion for all P planes in one flattened matmul.
            t_ref[...] = _sel_dot(x_ref[...], c, split="lhs")

            def one_plane(i):
                src = i * h
                dst = i * h_out
                if not isinstance(i, int):          # dynamic index (fori_loop path)
                    if h % 8 == 0:
                        src = pl.multiple_of(src, 8)
                    if h_out % 8 == 0:
                        dst = pl.multiple_of(dst, 8)
                ti = t_ref[pl.ds(src, h), :]                              # (H, W_out)
                o_ref[pl.ds(dst, h_out), :] = _sel_dot(r, ti, split="rhs")  # (H_out, W_out)

            if p <= 8:
                for i in range(p):                  # short static unroll
                    one_plane(i)
            else:
                def body(i, carry):
                    one_plane(i)
                    return carry
                lax.fori_loop(0, p, body, 0, unroll=8)

        expand(xr_ref, or_ref)
        expand(xi_ref, oi_ref)

    return kernel


# ----------------------------------------------------------------------------
# Wrapper
# ----------------------------------------------------------------------------
@functools.partial(jax.jit,
                   static_argnames=("size", "scale_factor", "mode", "align_corners"))
def complex_up_sampling(inp, size=None, scale_factor=None, mode="nearest",
                        align_corners=None):
    """Pallas implementation of ComplexUpSampling.forward (nearest mode).

    inp: complex array of shape (N, C, H, W) -> complex64 (N, C, H_out, W_out).
    """
    if mode != "nearest":
        raise NotImplementedError("only mode='nearest' is implemented")
    del align_corners  # no effect for 'nearest' (matches PyTorch)

    n, ch, h, w = inp.shape
    nc = n * ch

    if size is not None:
        if isinstance(size, (tuple, list)):
            h_out, w_out = int(size[0]), int(size[1])
        else:
            h_out = w_out = int(size)
        row_src = _nearest_src_indices(h, h_out)
        col_src = _nearest_src_indices(w, w_out)
    elif scale_factor is not None:
        if isinstance(scale_factor, (tuple, list)):
            sh, sw = float(scale_factor[0]), float(scale_factor[1])
        else:
            sh = sw = float(scale_factor)
        h_out = int(math.floor(h * sh))
        w_out = int(math.floor(w * sw))
        row_src = _nearest_src_indices(h, h_out, scale=sh)
        col_src = _nearest_src_indices(w, w_out, scale=sw)
    else:
        raise ValueError("either size or scale_factor must be given")

    # 0/1 selection matrices, exact in bf16, resident in VMEM (constant index_map -> no re-DMA).
    r_mat = jnp.asarray((row_src[:, None] == np.arange(h)[None, :]).astype(np.float32),
                        dtype=jnp.bfloat16)
    c_mat = jnp.asarray((np.arange(w)[:, None] == col_src[None, :]).astype(np.float32),
                        dtype=jnp.bfloat16)

    # TODO(synk): these two ops and the final lax.complex are XLA copy passes over HBM; a zero-copy
    # interleaved view needs a complex bitcast, which lax.bitcast_convert_type does not support.
    x_re = jnp.real(inp).astype(jnp.float32).reshape(nc * h, w)
    x_im = jnp.imag(inp).astype(jnp.float32).reshape(nc * h, w)

    p, vmem_limit = _plane_blocking(nc, h, w, h_out, w_out)
    grid = (nc // p,)

    out_re, out_im = pl.pallas_call(
        _make_upsample_kernel(p, h, h_out),
        out_shape=(jax.ShapeDtypeStruct((nc * h_out, w_out), jnp.float32),
                   jax.ShapeDtypeStruct((nc * h_out, w_out), jnp.float32)),
        grid_spec=pltpu.PrefetchScalarGridSpec(
            num_scalar_prefetch=0,
            grid=grid,
            in_specs=[
                pl.BlockSpec((p * h, w), lambda i: (i, 0)),
                pl.BlockSpec((p * h, w), lambda i: (i, 0)),
                pl.BlockSpec((h_out, h), lambda i: (0, 0)),
                pl.BlockSpec((w, w_out), lambda i: (0, 0)),
            ],
            out_specs=[
                pl.BlockSpec((p * h_out, w_out), lambda i: (i, 0)),
                pl.BlockSpec((p * h_out, w_out), lambda i: (i, 0)),
            ],
            scratch_shapes=[pltpu.VMEM((p * h, w_out), jnp.float32)],
        ),
        compiler_params=pltpu.CompilerParams(
            dimension_semantics=("parallel",),
            vmem_limit_bytes=vmem_limit,
        ),
    )(x_re, x_im, r_mat, c_mat)

    out_re = out_re.reshape(n, ch, h_out, w_out)
    out_im = out_im.reshape(n, ch, h_out, w_out)
    return lax.complex(out_re, out_im)


# ----------------------------------------------------------------------------
# Module-style wrappers (mirror the PyTorch classes)
# ----------------------------------------------------------------------------
class ComplexUpSampling:
    """JAX/Pallas counterpart of the PyTorch ComplexUpSampling module."""

    def __init__(self, size=None, scale_factor=None, mode="nearest", align_corners=None):
        self.size = tuple(size) if isinstance(size, (list, tuple)) else size
        self.scale_factor = (tuple(scale_factor) if isinstance(scale_factor, (list, tuple))
                             else scale_factor)
        self.mode = mode
        self.align_corners = align_corners

    def __call__(self, inp):
        return complex_up_sampling(inp, size=self.size, scale_factor=self.scale_factor,
                                   mode=self.mode, align_corners=self.align_corners)


class ComplexUpSamplingNearest2d(ComplexUpSampling):
    def __init__(self, size=None, scale_factor=None):
        super().__init__(size=size, scale_factor=scale_factor, mode="nearest")


# ----------------------------------------------------------------------------
# Demo / self-check
# ----------------------------------------------------------------------------
if __name__ == "__main__":
    key = jax.random.PRNGKey(0)
    k_re, k_im = jax.random.split(key)
    N, C, H, W = 2, 4, 16, 16
    real = jax.random.normal(k_re, (N, C, H, W), dtype=jnp.float32)
    imag = jax.random.normal(k_im, (N, C, H, W), dtype=jnp.float32)
    x = lax.complex(real, imag)

    # 1) integer scale factor: nearest == repeat
    up2 = ComplexUpSamplingNearest2d(scale_factor=2)
    out = jax.block_until_ready(up2(x))
    ref = jnp.repeat(jnp.repeat(x, 2, axis=2), 2, axis=3)
    assert out.shape == (N, C, 2 * H, 2 * W)
    assert out.dtype == jnp.complex64
    assert bool(jnp.allclose(out, ref, atol=1e-6, rtol=0.0)), "mismatch vs repeat reference"

    # 2) explicit (non-integer ratio) size path
    up_sz = ComplexUpSamplingNearest2d(size=(24, 40))
    out2 = jax.block_until_ready(up_sz(x))
    row_src = (np.arange(24) * H) // 24
    col_src = (np.arange(40) * W) // 40
    ref2 = x[:, :, row_src, :][:, :, :, col_src]
    assert out2.shape == (N, C, 24, 40)
    assert out2.dtype == jnp.complex64
    assert bool(jnp.allclose(out2, ref2, atol=1e-6, rtol=0.0)), "mismatch vs gather reference"

    print("KERNEL_OK")
</pallas_src>

<mosaic_0001>
module attributes {stable_mosaic.version = 11 : i64} {
  func.func @kernel(%arg0: i32, %arg1: memref<32x16xf32, #tpu.memory_space<vmem>>, %arg2: memref<32x16xf32, #tpu.memory_space<vmem>>, %arg3: memref<32x16xbf16, #tpu.memory_space<vmem>>, %arg4: memref<16x32xbf16, #tpu.memory_space<vmem>>, %arg5: memref<64x32xf32, #tpu.memory_space<vmem>>, %arg6: memref<64x32xf32, #tpu.memory_space<vmem>>, %arg7: memref<32x32xf32, #tpu.memory_space<vmem>>) attributes {dimension_semantics = [#tpu.dimension_semantics<parallel>], iteration_bounds = array<i64: 4>, scalar_prefetch = 0 : i64, scratch_operands = 1 : i64, tpu.core_type = #tpu.core_type<tc>, window_params = [{transform_indices = @transform_0, window_bounds = array<i64: 32, 16>}, {transform_indices = @transform_1, window_bounds = array<i64: 32, 16>}, {pipeline_mode = #tpu.pipeline_mode<synchronous>, transform_indices = @transform_2, window_bounds = array<i64: 32, 16>}, {pipeline_mode = #tpu.pipeline_mode<synchronous>, transform_indices = @transform_3, window_bounds = array<i64: 16, 32>}, {transform_indices = @transform_4, window_bounds = array<i64: 64, 32>}, {transform_indices = @transform_5, window_bounds = array<i64: 64, 32>}]} {
    %c0 = arith.constant 0 : index
    %c0_0 = arith.constant 0 : index
    %0 = vector.load %arg3[%c0, %c0_0] : memref<32x16xbf16, #tpu.memory_space<vmem>>, vector<32x16xbf16>
    %c0_1 = arith.constant 0 : index
    %c0_2 = arith.constant 0 : index
    %1 = vector.load %arg4[%c0_1, %c0_2] : memref<16x32xbf16, #tpu.memory_space<vmem>>, vector<16x32xbf16>
    %c0_3 = arith.constant 0 : index
    %c0_4 = arith.constant 0 : index
    %2 = vector.load %arg1[%c0_3, %c0_4] : memref<32x16xf32, #tpu.memory_space<vmem>>, vector<32x16xf32>
    %3 = arith.truncf %2 : vector<32x16xf32> to vector<32x16xbf16>
    %4 = arith.extf %3 : vector<32x16xbf16> to vector<32x16xf32>
    %5 = arith.subf %2, %4 : vector<32x16xf32>
    %6 = arith.truncf %5 : vector<32x16xf32> to vector<32x16xbf16>
    %7 = arith.extf %6 : vector<32x16xbf16> to vector<32x16xf32>
    %8 = arith.subf %5, %7 : vector<32x16xf32>
    %9 = arith.truncf %8 : vector<32x16xf32> to vector<32x16xbf16>
    %cst = arith.constant dense<0.000000e+00> : vector<32x32xf32>
    %10 = tpu.matmul %3, %1, %cst {dimension_numbers = #tpu.dot_dimension_numbers<[1], [0], [0], [1], [0, 0, 1, 1], [], []>} : vector<32x16xbf16>, vector<16x32xbf16>, vector<32x32xf32> -> vector<32x32xf32>
    %cst_5 = arith.constant dense<0.000000e+00> : vector<32x32xf32>
    %11 = tpu.matmul %6, %1, %cst_5 {dimension_numbers = #tpu.dot_dimension_numbers<[1], [0], [0], [1], [0, 0, 1, 1], [], []>} : vector<32x16xbf16>, vector<16x32xbf16>, vector<32x32xf32> -> vector<32x32xf32>
    %12 = arith.addf %10, %11 : vector<32x32xf32>
    %cst_6 = arith.constant dense<0.000000e+00> : vector<32x32xf32>
    %13 = tpu.matmul %9, %1, %cst_6 {dimension_numbers = #tpu.dot_dimension_numbers<[1], [0], [0], [1], [0, 0, 1, 1], [], []>} : vector<32x16xbf16>, vector<16x32xbf16>, vector<32x32xf32> -> vector<32x32xf32>
    %14 = arith.addf %12, %13 : vector<32x32xf32>
    %c0_7 = arith.constant 0 : index
    %c0_8 = arith.constant 0 : index
    %15 = vector.load %arg7[%c0_7, %c0_8] : memref<32x32xf32, #tpu.memory_space<vmem>>, vector<32x32xf32>
    tpu.vector_store %arg7[%c0_7, %c0_8], %14 {strides = array<i32>} : memref<32x32xf32, #tpu.memory_space<vmem>>, vector<32x32xf32>,
    %c0_9 = arith.constant 0 : index
    %c0_10 = arith.constant 0 : index
    %16 = vector.load %arg7[%c0_9, %c0_10] : memref<32x32xf32, #tpu.memory_space<vmem>>, vector<16x32xf32>
    %17 = arith.truncf %16 : vector<16x32xf32> to vector<16x32xbf16>
    %18 = arith.extf %17 : vector<16x32xbf16> to vector<16x32xf32>
    %19 = arith.subf %16, %18 : vector<16x32xf32>
    %20 = arith.truncf %19 : vector<16x32xf32> to vector<16x32xbf16>
    %21 = arith.extf %20 : vector<16x32xbf16> to vector<16x32xf32>
    %22 = arith.subf %19, %21 : vector<16x32xf32>
    %23 = arith.truncf %22 : vector<16x32xf32> to vector<16x32xbf16>
    %cst_11 = arith.constant dense<0.000000e+00> : vector<32x32xf32>
    %24 = tpu.matmul %0, %17, %cst_11 {dimension_numbers = #tpu.dot_dimension_numbers<[1], [0], [0], [1], [0, 0, 1, 1], [], []>} : vector<32x16xbf16>, vector<16x32xbf16>, vector<32x32xf32> -> vector<32x32xf32>
    %cst_12 = arith.constant dense<0.000000e+00> : vector<32x32xf32>
    %25 = tpu.matmul %0, %20, %cst_12 {dimension_numbers = #tpu.dot_dimension_numbers<[1], [0], [0], [1], [0, 0, 1, 1], [], []>} : vector<32x16xbf16>, vector<16x32xbf16>, vector<32x32xf32> -> vector<32x32xf32>
    %26 = arith.addf %24, %25 : vector<32x32xf32>
    %cst_13 = arith.constant dense<0.000000e+00> : vector<32x32xf32>
    %27 = tpu.matmul %0, %23, %cst_13 {dimension_numbers = #tpu.dot_dimension_numbers<[1], [0], [0], [1], [0, 0, 1, 1], [], []>} : vector<32x16xbf16>, vector<16x32xbf16>, vector<32x32xf32> -> vector<32x32xf32>
    %28 = arith.addf %26, %27 : vector<32x32xf32>
    %c0_14 = arith.constant 0 : index
    %c0_15 = arith.constant 0 : index
    %29 = vector.load %arg5[%c0_14, %c0_15] : memref<64x32xf32, #tpu.memory_space<vmem>>, vector<32x32xf32>
    tpu.vector_store %arg5[%c0_14, %c0_15], %28 {strides = array<i32>} : memref<64x32xf32, #tpu.memory_space<vmem>>, vector<32x32xf32>,
    %c16 = arith.constant 16 : index
    %c0_16 = arith.constant 0 : index
    %30 = vector.load %arg7[%c16, %c0_16] : memref<32x32xf32, #tpu.memory_space<vmem>>, vector<16x32xf32>
    %31 = arith.truncf %30 : vector<16x32xf32> to vector<16x32xbf16>
    %32 = arith.extf %31 : vector<16x32xbf16> to vector<16x32xf32>
    %33 = arith.subf %30, %32 : vector<16x32xf32>
    %34 = arith.truncf %33 : vector<16x32xf32> to vector<16x32xbf16>
    %35 = arith.extf %34 : vector<16x32xbf16> to vector<16x32xf32>
    %36 = arith.subf %33, %35 : vector<16x32xf32>
    %37 = arith.truncf %36 : vector<16x32xf32> to vector<16x32xbf16>
    %cst_17 = arith.constant dense<0.000000e+00> : vector<32x32xf32>
    %38 = tpu.matmul %0, %31, %cst_17 {dimension_numbers = #tpu.dot_dimension_numbers<[1], [0], [0], [1], [0, 0, 1, 1], [], []>} : vector<32x16xbf16>, vector<16x32xbf16>, vector<32x32xf32> -> vector<32x32xf32>
    %cst_18 = arith.constant dense<0.000000e+00> : vector<32x32xf32>
    %39 = tpu.matmul %0, %34, %cst_18 {dimension_numbers = #tpu.dot_dimension_numbers<[1], [0], [0], [1], [0, 0, 1, 1], [], []>} : vector<32x16xbf16>, vector<16x32xbf16>, vector<32x32xf32> -> vector<32x32xf32>
    %40 = arith.addf %38, %39 : vector<32x32xf32>
    %cst_19 = arith.constant dense<0.000000e+00> : vector<32x32xf32>
    %41 = tpu.matmul %0, %37, %cst_19 {dimension_numbers = #tpu.dot_dimension_numbers<[1], [0], [0], [1], [0, 0, 1, 1], [], []>} : vector<32x16xbf16>, vector<16x32xbf16>, vector<32x32xf32> -> vector<32x32xf32>
    %42 = arith.addf %40, %41 : vector<32x32xf32>
    %c32 = arith.constant 32 : index
    %c0_20 = arith.constant 0 : index
    %43 = vector.load %arg5[%c32, %c0_20] : memref<64x32xf32, #tpu.memory_space<vmem>>, vector<32x32xf32>
    tpu.vector_store %arg5[%c32, %c0_20], %42 {strides = array<i32>} : memref<64x32xf32, #tpu.memory_space<vmem>>, vector<32x32xf32>,
    %c0_21 = arith.constant 0 : index
    %c0_22 = arith.constant 0 : index
    %44 = vector.load %arg2[%c0_21, %c0_22] : memref<32x16xf32, #tpu.memory_space<vmem>>, vector<32x16xf32>
    %45 = arith.truncf %44 : vector<32x16xf32> to vector<32x16xbf16>
    %46 = arith.extf %45 : vector<32x16xbf16> to vector<32x16xf32>
    %47 = arith.subf %44, %46 : vector<32x16xf32>
    %48 = arith.truncf %47 : vector<32x16xf32> to vector<32x16xbf16>
    %49 = arith.extf %48 : vector<32x16xbf16> to vector<32x16xf32>
    %50 = arith.subf %47, %49 : vector<32x16xf32>
    %51 = arith.truncf %50 : vector<32x16xf32> to vector<32x16xbf16>
    %cst_23 = arith.constant dense<0.000000e+00> : vector<32x32xf32>
    %52 = tpu.matmul %45, %1, %cst_23 {dimension_numbers = #tpu.dot_dimension_numbers<[1], [0], [0], [1], [0, 0, 1, 1], [], []>} : vector<32x16xbf16>, vector<16x32xbf16>, vector<32x32xf32> -> vector<32x32xf32>
    %cst_24 = arith.constant dense<0.000000e+00> : vector<32x32xf32>
    %53 = tpu.matmul %48, %1, %cst_24 {dimension_numbers = #tpu.dot_dimension_numbers<[1], [0], [0], [1], [0, 0, 1, 1], [], []>} : vector<32x16xbf16>, vector<16x32xbf16>, vector<32x32xf32> -> vector<32x32xf32>
    %54 = arith.addf %52, %53 : vector<32x32xf32>
    %cst_25 = arith.constant dense<0.000000e+00> : vector<32x32xf32>
    %55 = tpu.matmul %51, %1, %cst_25 {dimension_numbers = #tpu.dot_dimension_numbers<[1], [0], [0], [1], [0, 0, 1, 1], [], []>} : vector<32x16xbf16>, vector<16x32xbf16>, vector<32x32xf32> -> vector<32x32xf32>
    %56 = arith.addf %54, %55 : vector<32x32xf32>
    %c0_26 = arith.constant 0 : index
    %c0_27 = arith.constant 0 : index
    %57 = vector.load %arg7[%c0_26, %c0_27] : memref<32x32xf32, #tpu.memory_space<vmem>>, vector<32x32xf32>
    tpu.vector_store %arg7[%c0_26, %c0_27], %56 {strides = array<i32>} : memref<32x32xf32, #tpu.memory_space<vmem>>, vector<32x32xf32>,
    %c0_28 = arith.constant 0 : index
    %c0_29 = arith.constant 0 : index
    %58 = vector.load %arg7[%c0_28, %c0_29] : memref<32x32xf32, #tpu.memory_space<vmem>>, vector<16x32xf32>
    %59 = arith.truncf %58 : vector<16x32xf32> to vector<16x32xbf16>
    %60 = arith.extf %59 : vector<16x32xbf16> to vector<16x32xf32>
    %61 = arith.subf %58, %60 : vector<16x32xf32>
    %62 = arith.truncf %61 : vector<16x32xf32> to vector<16x32xbf16>
    %63 = arith.extf %62 : vector<16x32xbf16> to vector<16x32xf32>
    %64 = arith.subf %61, %63 : vector<16x32xf32>
    %65 = arith.truncf %64 : vector<16x32xf32> to vector<16x32xbf16>
    %cst_30 = arith.constant dense<0.000000e+00> : vector<32x32xf32>
    %66 = tpu.matmul %0, %59, %cst_30 {dimension_numbers = #tpu.dot_dimension_numbers<[1], [0], [0], [1], [0, 0, 1, 1], [], []>} : vector<32x16xbf16>, vector<16x32xbf16>, vector<32x32xf32> -> vector<32x32xf32>
    %cst_31 = arith.constant dense<0.000000e+00> : vector<32x32xf32>
    %67 = tpu.matmul %0, %62, %cst_31 {dimension_numbers = #tpu.dot_dimension_numbers<[1], [0], [0], [1], [0, 0, 1, 1], [], []>} : vector<32x16xbf16>, vector<16x32xbf16>, vector<32x32xf32> -> vector<32x32xf32>
    %68 = arith.addf %66, %67 : vector<32x32xf32>
    %cst_32 = arith.constant dense<0.000000e+00> : vector<32x32xf32>
    %69 = tpu.matmul %0, %65, %cst_32 {dimension_numbers = #tpu.dot_dimension_numbers<[1], [0], [0], [1], [0, 0, 1, 1], [], []>} : vector<32x16xbf16>, vector<16x32xbf16>, vector<32x32xf32> -> vector<32x32xf32>
    %70 = arith.addf %68, %69 : vector<32x32xf32>
    %c0_33 = arith.constant 0 : index
    %c0_34 = arith.constant 0 : index
    %71 = vector.load %arg6[%c0_33, %c0_34] : memref<64x32xf32, #tpu.memory_space<vmem>>, vector<32x32xf32>
    tpu.vector_store %arg6[%c0_33, %c0_34], %70 {strides = array<i32>} : memref<64x32xf32, #tpu.memory_space<vmem>>, vector<32x32xf32>,
    %c16_35 = arith.constant 16 : index
    %c0_36 = arith.constant 0 : index
    %72 = vector.load %arg7[%c16_35, %c0_36] : memref<32x32xf32, #tpu.memory_space<vmem>>, vector<16x32xf32>
    %73 = arith.truncf %72 : vector<16x32xf32> to vector<16x32xbf16>
    %74 = arith.extf %73 : vector<16x32xbf16> to vector<16x32xf32>
    %75 = arith.subf %72, %74 : vector<16x32xf32>
    %76 = arith.truncf %75 : vector<16x32xf32> to vector<16x32xbf16>
    %77 = arith.extf %76 : vector<16x32xbf16> to vector<16x32xf32>
    %78 = arith.subf %75, %77 : vector<16x32xf32>
    %79 = arith.truncf %78 : vector<16x32xf32> to vector<16x32xbf16>
    %cst_37 = arith.constant dense<0.000000e+00> : vector<32x32xf32>
    %80 = tpu.matmul %0, %73, %cst_37 {dimension_numbers = #tpu.dot_dimension_numbers<[1], [0], [0], [1], [0, 0, 1, 1], [], []>} : vector<32x16xbf16>, vector<16x32xbf16>, vector<32x32xf32> -> vector<32x32xf32>
    %cst_38 = arith.constant dense<0.000000e+00> : vector<32x32xf32>
    %81 = tpu.matmul %0, %76, %cst_38 {dimension_numbers = #tpu.dot_dimension_numbers<[1], [0], [0], [1], [0, 0, 1, 1], [], []>} : vector<32x16xbf16>, vector<16x32xbf16>, vector<32x32xf32> -> vector<32x32xf32>
    %82 = arith.addf %80, %81 : vector<32x32xf32>
    %cst_39 = arith.constant dense<0.000000e+00> : vector<32x32xf32>
    %83 = tpu.matmul %0, %79, %cst_39 {dimension_numbers = #tpu.dot_dimension_numbers<[1], [0], [0], [1], [0, 0, 1, 1], [], []>} : vector<32x16xbf16>, vector<16x32xbf16>, vector<32x32xf32> -> vector<32x32xf32>
    %84 = arith.addf %82, %83 : vector<32x32xf32>
    %c32_40 = arith.constant 32 : index
    %c0_41 = arith.constant 0 : index
    %85 = vector.load %arg6[%c32_40, %c0_41] : memref<64x32xf32, #tpu.memory_space<vmem>>, vector<32x32xf32>
    tpu.vector_store %arg6[%c32_40, %c0_41], %84 {strides = array<i32>} : memref<64x32xf32, #tpu.memory_space<vmem>>, vector<32x32xf32>,
    return
  }
  func.func @transform_0(%arg0: i32) -> (i32, i32) {
    %c0_i32 = arith.constant 0 : i32
    %c0_i32_0 = arith.constant 0 : i32
    return %arg0, %c0_i32 : i32, i32
  }
  func.func @transform_1(%arg0: i32) -> (i32, i32) {
    %c0_i32 = arith.constant 0 : i32
    %c0_i32_0 = arith.constant 0 : i32
    return %arg0, %c0_i32 : i32, i32
  }
  func.func @transform_2(%arg0: i32) -> (i32, i32) {
    %c0_i32 = arith.constant 0 : i32
    %c0_i32_0 = arith.constant 0 : i32
    %c0_i32_1 = arith.constant 0 : i32
    return %c0_i32, %c0_i32_0 : i32, i32
  }
  func.func @transform_3(%arg0: i32) -> (i32, i32) {
    %c0_i32 = arith.constant 0 : i32
    %c0_i32_0 = arith.constant 0 : i32
    %c0_i32_1 = arith.constant 0 : i32
    return %c0_i32, %c0_i32_0 : i32, i32
  }
  func.func @transform_4(%arg0: i32) -> (i32, i32) {
    %c0_i32 = arith.constant 0 : i32
    %c0_i32_0 = arith.constant 0 : i32
    return %arg0, %c0_i32 : i32, i32
  }
  func.func @transform_5(%arg0: i32) -> (i32, i32) {
    %c0_i32 = arith.constant 0 : i32
    %c0_i32_0 = arith.constant 0 : i32
    return %arg0, %c0_i32 : i32, i32
  }
}

</mosaic_0001>

<bundles_post_ra>
// kernel: custom-call
= control target key start
LH: loop header
LB: loop body
LE: loop exit
PB: predicated region body
PF: predicated region fallthrough
CT: control target
= control target key end

     0   :  { %2 = vsyncpa [#allocation0], 0  ;;  %s55_s0 = inlined_call_operand.hbm [shape: c64[2,4,16,16], index: 0, kind: input, shape index: {}]   ;;  %s56_s1 = inlined_call_operand.vmem [shape: f32[2,4,16,16], index: 1, kind: output, shape index: {}]  }
   0x1   :  { %s4_s8 = sshll.u32 %s55_s0, 4  ;;  %s6_s11 = sshll.u32 %s56_s1, 4  ;;  %s5_s8 = int_to_ptr.hbm [resolvable:$true] %s4_s8  ;;  %s7_s11 = int_to_ptr.vmem [resolvable:$true] %s6_s11 }
   0x2   :  { %9 = dma.hbm_to_vmem [thread:$0]  %s5_s8, 2048, %s7_s11, [#allocation0] }
   0x3   :  { %37 = dma.done.wait [#allocation0], 2048  }
   0x4   :  { %38 = vsyncadd [#allocation0], 4294965248 }
   0x5   :  { %12 = vsyncpa [#allocation0], 1 }

// kernel: custom-call.2
= control target key start
LH: loop header
LB: loop body
LE: loop exit
PB: predicated region body
PF: predicated region fallthrough
CT: control target
= control target key end

     0   :  { %s105_s0 = inlined_call_operand.vmem [shape: f32[2,4,32,32], index: 0, kind: input, shape index: {}]   ;;  %s106_s1 = inlined_call_operand.vmem [shape: f32[2,4,32,32], index: 1, kind: input, shape index: {}]   ;;  %s107_s2 = inlined_call_operand.hbm [shape: c64[2,4,32,32], index: 2, kind: output, shape index: {}]  }
   0x1   :  { %s3_s11 = scalar_lea.hbm %s107_s2, 256 }
   0x2   :  { %4 = vsyncpa [#allocation0], 0  ;;  %s6_s14 = sshll.u32 %s105_s0, 4  ;;  %s8_s17 = sshll.u32 %s107_s2, 4  ;;  %s7_s14 = int_to_ptr.vmem [resolvable:$true] %s6_s14  ;;  %s9_s17 = int_to_ptr.hbm [resolvable:$true] %s8_s17 }
   0x3   :  { %11 = dma.vmem_to_hbm [thread:$0]  %s7_s14, 4096, %s9_s17, [#allocation0] }
   0x4   :  { %74 = dma.done.wait [#allocation0], 4096  }
   0x5   :  { %75 = vsyncadd [#allocation0], 4294963200 }
   0x6   :  { %14 = vsyncpa [#allocation0], 1 }
   0x7   :  { %15 = vsyncpa [#allocation1], 0  ;;  %s17_s20 = sshll.u32 %s106_s1, 4  ;;  %s19_s21 = sshll.u32 %s3_s11, 4  ;;  %s18_s20 = int_to_ptr.vmem [resolvable:$true] %s17_s20  ;;  %s20_s21 = int_to_ptr.hbm [resolvable:$true] %s19_s21 }
   0x8   :  { %22 = dma.vmem_to_hbm [thread:$0]  %s18_s20, 4096, %s20_s21, [#allocation1] }
   0x9   :  { %76 = dma.done.wait [#allocation1], 4096  }
   0xa   :  { %77 = vsyncadd [#allocation1], 4294963200 }
   0xb   :  { %25 = vsyncpa [#allocation1], 1 }

// kernel: custom-call.1
= control target key start
LH: loop header
LB: loop body
LE: loop exit
PB: predicated region body
PF: predicated region fallthrough
CT: control target
= control target key end

     0   :  { %s56_s0 = inlined_call_operand.hbm [shape: c64[2,4,16,16], index: 0, kind: input, shape index: {}]   ;;  %s57_s1 = inlined_call_operand.vmem [shape: f32[2,4,16,16], index: 1, kind: output, shape index: {}]  }
   0x1   :  { %s2_s8 = scalar_lea.hbm %s56_s0, 128 }
   0x2   :  { %3 = vsyncpa [#allocation0], 0  ;;  %s5_s9 = sshll.u32 %s2_s8, 4  ;;  %s7_s12 = sshll.u32 %s57_s1, 4  ;;  %s6_s9 = int_to_ptr.hbm [resolvable:$true] %s5_s9  ;;  %s8_s12 = int_to_ptr.vmem [resolvable:$true] %s7_s12 }
   0x3   :  { %10 = dma.hbm_to_vmem [thread:$0]  %s6_s9, 2048, %s8_s12, [#allocation0] }
   0x4   :  { %38 = dma.done.wait [#allocation0], 2048  }
   0x5   :  { %39 = vsyncadd [#allocation0], 4294965248 }
   0x6   :  { %13 = vsyncpa [#allocation0], 1 }

// kernel: complex_up_sampling.1
= control target key start
LH: loop header
LB: loop body
LE: loop exit
PB: predicated region body
PF: predicated region fallthrough
CT: control target
= control target key end

     0   :  { %11 = vsyncpa [#allocation4], 0  ;;  %s1484_s0 = inlined_call_operand.vmem [shape: f32[128,16], index: 0, kind: input, shape index: {}]   ;;  %s1485_s1 = inlined_call_operand.vmem [shape: f32[128,16], index: 1, kind: input, shape index: {}]   ;;  %s1486_s2 = inlined_call_operand.hbm [shape: bf16[32,16], index: 2, kind: input, shape index: {}]   ;;  %s1487_s3 = inlined_call_operand.hbm [shape: bf16[16,32], index: 3, kind: input, shape index: {}]   ;;  %s1488_s4 = inlined_call_operand.vmem [shape: f32[256,32], index: 4, kind: output, shape index: {0}]   ;;  %s1489_s5 = inlined_call_operand.vmem [shape: f32[256,32], index: 5, kind: output, shape index: {1}]  }
   0x1   :  { %12 = vsyncpa [#allocation6], 0  ;;  %s1300_s18 = smov 0  }
   0x2 LB: > { %s180_s21 = sshll.u32 %s1486_s2, 4  ;;  %s1309_s22 = sadd.s32 4294967295, %s1264_s18   ;;  %s1264_s18 = sphi %s1300_s18, %s18_s18   ;;  %s181_s21 = int_to_ptr.hbm [resolvable:$true] %s180_s21 }
   0x3   : > { %p1089_p0 = scmp.ge.s32.totalorder %s1264_s18, 1  ;;  %p169_p1 = scmp.lt.s32.totalorder %s1264_s18, 5 }
   0x4   : > { %p1174_p2 = scmp.eq.s32.totalorder %s1309_s22, 0  ;;  %s1266_s24 = smov [#allocation3]  }
   0x5   : > { %p1314_p3 = pnand %p1089_p0, %p169_p1  ;;  %s182_s25 = sshll.u32 %s1266_s24, 4  ;;  %s183_s25 = int_to_ptr.vmem [resolvable:$true] %s182_s25 }
   0x6   : > { %s194_s28 = sshll.u32 %s1487_s3, 4  ;;  %s1267_s29 = smov [#allocation5]   ;;  %s195_s28 = int_to_ptr.hbm [resolvable:$true] %s194_s28 }
   0x7   : > { %p1167_p4 = pneg %p1314_p3  ;;  %s196_s30 = sshll.u32 %s1267_s29, 4  ;;  %s197_s30 = int_to_ptr.vmem [resolvable:$true] %s196_s30 }
   0x8   : > { %s1268_s6 = smov 64   ;;  %s1269_s7 = smov 4  }
   0x9   : > { %p1168_p5 = pnand %p1174_p2, %p1167_p4  ;;  %230 = sbr.rel (%p1314_p3) target bundleno = 633 (0x279), region = 36 }
   0xb   : > { %1170 = dma.hbm_to_vmem [thread:$0]  (!%p1168_p5), %s181_s21, 256, %s183_s25, [#allocation4], %s1268_s6, %s1268_s6, %s1269_s7  }
   0xc   : > { %1173 = dma.hbm_to_vmem [thread:$0]  (!%p1168_p5), %s195_s28, 128, %s197_s30, [#allocation6], %s1268_s6, %s1268_s6, %s1269_s7  }
   0xe   : > { %1255 = dma.done.wait (%p1174_p2), [#allocation4], 256  }
   0xf   : > { %1257 = vsyncadd (%p1174_p2), [#allocation4], 4294967040 }
  0x10   : > { %1259 = dma.done.wait (%p1174_p2), [#allocation6], 128  }
  0x11   : > { %1261 = vsyncadd (%p1174_p2), [#allocation6], 4294967168  ;;  %s1096_s8 = sshll.u32 %s1309_s22, 2  ;;  %v1344_v0 = vld [vmem:[#allocation5] sm:$0xff]  ;;  %vm351_vm0 = vcmask 130048   ;;  %vm441_vm1 = vcmask 261120  }
  0x12   : > { %p275_p6 = scmp.lt.s32.totalorder %s1096_s8, 15  ;;  %1157 = vmatpush.bf16.msra.mxu2 %v1344_v0  ;;  %1158 = vmatpush.bf16.msra.mxu3 %v1344_v0  ;;  %s1100_s16 = sshll.u32 %s1309_s22, 3 }
  0x13   : > { %365 = vmatpush.bf16.msra.mxu0 %v1344_v0  ;;  %400 = vmatpush.bf16.msra.mxu1 %v1344_v0  ;;  %p287_p7 = scmp.lt.s32.totalorder %s1100_s16, 31 }
  0x14   : > { %s1492_s8 = smov (!%p275_p6, %s1096_s8), 15 }
  0x15   : > { %s1097_s9 = sshll.u32 %s1492_s8, 3  ;;  %s1494_s16 = smov (!%p287_p7, %s1100_s16), 31 }
  0x16   : > { %s278_s12 = scalar_lea.vmem %s1484_s0, %s1097_s9  ;;  %425 = vmatpush.bf16.msrb.mxu2 %v1344_v0  ;;  %s284_s15 = scalar_lea.vmem %s1485_s1, %s1097_s9 }
  0x17   : > { %v307_v1 = vld [vmem:[%s278_s12 + $0x10] sm:$0xff]  ;;  %v308_v2 = vld [vmem:[%s278_s12 + $0x18] sm:$0xff]  ;;  %v305_v5 = vld [vmem:[%s278_s12] sm:$0xff]  ;;  %s1101_s17 = sshll.u32 %s1494_s16, 3 }
  0x18   : > { %v311_v3 = vpack.c.bf16 %v307_v1, %v307_v1  ;;  %v312_v4 = vpack.c.bf16 %v308_v2, %v308_v2  ;;  %v306_v6 = vld [vmem:[%s278_s12 + $0x8] sm:$0xff]  ;;  %v309_v7 = vpack.c.bf16 %v305_v5, %v305_v5  ;;  %s1412_s21 = scalar_lea.vmem %s1488_s4, %s1101_s17  ;;  %s1463_s24 = scalar_lea.vmem %s1489_s5, %s1101_s17 }
  0x19   : > { %v310_v8 = vpack.c.bf16 %v306_v6, %v306_v6 }
  0x1a   : > { %v315_v9 = vunpack.c.l.bf16 %v311_v3  ;;  %v316_v10 = vunpack.c.l.bf16 %v312_v4  ;;  %v383_v11 = vunpack.c.l.b16 %v311_v3  ;;  %v384_v12 = vunpack.c.l.b16 %v312_v4 }
  0x1b   : > { %v313_v13 = vunpack.c.l.bf16 %v309_v7  ;;  %v314_v14 = vunpack.c.l.bf16 %v310_v8  ;;  %v381_v15 = vunpack.c.l.b16 %v309_v7  ;;  %v382_v16 = vunpack.c.l.b16 %v310_v8 }
  0x1c   : > { %v319_v17 = vsub.f32 %v307_v1, %v315_v9  ;;  %v320_v18 = vsub.f32 %v308_v2, %v316_v10  ;;  %v386_v19 = vpack.c.b16 %v384_v12, %v383_v11 }
  0x1d   : > { %v317_v20 = vsub.f32 %v305_v5, %v313_v13  ;;  %v318_v21 = vsub.f32 %v306_v6, %v314_v14  ;;  %v385_v22 = vpack.c.b16 %v382_v16, %v381_v15  ;;  %v1360_v14 = vld [vmem:[#allocation3] sm:$0xff] }
  0x1e   : > { %v323_v23 = vpack.c.bf16 %v319_v17, %v319_v17  ;;  %v324_v24 = vpack.c.bf16 %v320_v18, %v320_v18  ;;  %1111 = vmatmul.msk.bf16.vlgmr.msra.gmra.mxu3 %vm351_vm0, %v386_v19 }
  0x1f   : > { %v321_v25 = vpack.c.bf16 %v317_v20, %v317_v20  ;;  %v322_v26 = vpack.c.bf16 %v318_v21, %v318_v21  ;;  %1110 = vmatmul.msk.bf16.vlgmr.msra.gmra.mxu1 %vm351_vm0, %v385_v22 }
  0x20   : > { %v341_v27 = vunpack.c.l.b16 %v323_v23  ;;  %v342_v28 = vunpack.c.l.b16 %v324_v24  ;;  %v327_v38 = vunpack.c.l.bf16 %v323_v23  ;;  %v328_v39 = vunpack.c.l.bf16 %v324_v24 }
  0x21   : > { %v339_v29 = vunpack.c.l.b16 %v321_v25  ;;  %v340_v30 = vunpack.c.l.b16 %v322_v26  ;;  %v325_v33 = vunpack.c.l.bf16 %v321_v25  ;;  %v326_v34 = vunpack.c.l.bf16 %v322_v26 }
  0x22   : > { %v344_v31 = vpack.c.b16 %v342_v28, %v341_v27  ;;  %v331_v40 = vsub.f32 %v319_v17, %v327_v38  ;;  %v332_v41 = vsub.f32 %v320_v18, %v328_v39 }
  0x23   : > { %v343_v32 = vpack.c.b16 %v340_v30, %v339_v29  ;;  %v329_v35 = vsub.f32 %v317_v20, %v325_v33  ;;  %v330_v36 = vsub.f32 %v318_v21, %v326_v34 }
  0x24   : > { %1109 = vmatmul.msk.bf16.vlgmr.msra.gmra.mxu2 %vm351_vm0, %v344_v31  ;;  %v334_v42 = vpack.c.bf16 %v332_v41, %v331_v40 }
  0x25   : > { %1108 = vmatmul.msk.bf16.vlgmr.msra.gmra.mxu0 %vm351_vm0, %v343_v32  ;;  %v333_v37 = vpack.c.bf16 %v330_v36, %v329_v35  ;;  %v1370_v36 = vld [vmem:[#allocation3 + $0x8] sm:$0xff] }
  0x34   : > { %1112 = vmatmul.msk.bf16.vlgmr.msrb.gmra.mxu2 %vm351_vm0, %v333_v37 }
  0x44   : > { %1113 = vmatmul.msk.bf16.gmra.mxu2 %vm351_vm0, %v334_v42 }
  0x9c   : > { %v402_v46 = vpop.f32.mrf.mxu1 }
  0xa1   : > { %v407_v55 = vpop.f32.mrf.mxu3 }
  0xa2   : > { %v367_v45 = vpop.f32.mrf.mxu0 }
  0xa3   : > { %v403_v47 = vadd.f32 %v402_v46, %v367_v45  ;;  %v647_v45 = vld [vmem:[%s284_s15 + $0x8] sm:$0xff] }
  0xa4   : > { %v404_v51 = vpop.f32.mrf.mxu1 }
  0xa7   : > { %v372_v43 = vpop.f32.mrf.mxu2 }
  0xa8   : > { %v408_v59 = vadd.f32 %v407_v55, %v372_v43 }
  0xa9   : > { %v409_v2 = vpop.f32.mrf.mxu3 }
  0xaa   : > { %v369_v50 = vpop.f32.mrf.mxu0 }
  0xab   : > { %v405_v52 = vadd.f32 %v404_v51, %v369_v50 }
  0xaf   : > { %v374_v44 = vpop.f32.mrf.mxu2 }
  0xb0   : > { %v410_v7 = vadd.f32 %v409_v2, %v374_v44  ;;  %v646_v44 = vld [vmem:[%s284_s15] sm:$0xff] }
  0xb1   : > { %v650_v46 = vpack.c.bf16 %v646_v44, %v646_v44 }
  0xb7   : > { %v427_v48 = vpop.f32.mrf.mxu2 }
  0xb8   : > { %v437_v49 = vadd.f32 %v427_v48, %v403_v47  ;;  %v651_v47 = vpack.c.bf16 %v647_v45, %v647_v45  ;;  %v654_v48 = vunpack.c.l.bf16 %v650_v46 }
  0xba   : > { %442 = vst.msk [vmem:[#allocation2] sm:$0xff] %vm441_vm1, %v437_v49  ;;  %v655_v49 = vunpack.c.l.bf16 %v651_v47  ;;  %v658_v50 = vsub.f32 %v646_v44, %v654_v48 }
  0xbc   : > { %v659_v51 = vsub.f32 %v647_v45, %v655_v49 }
  0xbf   : > { %v429_v53 = vpop.f32.mrf.mxu2 }
  0xc0   : > { %v438_v54 = vadd.f32 %v429_v53, %v405_v52  ;;  %v662_v52 = vpack.c.bf16 %v658_v50, %v658_v50 }
  0xc1   : > { %v446_v56 = vld [vmem:[#allocation2] sm:$0xff] }
  0xc2   : > { %443 = vst.msk [vmem:[#allocation2 + $0x8] sm:$0xff] %vm441_vm1, %v438_v54  ;;  %v448_v57 = vpack.c.bf16 %v446_v56, %v446_v56  ;;  %v680_v53 = vunpack.c.l.b16 %v662_v52 }
  0xc4   : > { %v450_v58 = vunpack.c.l.bf16 %v448_v57  ;;  %v504_v4 = vunpack.c.l.b16 %v448_v57  ;;  %v649_v57 = vld [vmem:[%s284_s15 + $0x18] sm:$0xff] }
  0xc6   : > { %v452_v62 = vsub.f32 %v446_v56, %v450_v58  ;;  %v648_v56 = vld [vmem:[%s284_s15 + $0x10] sm:$0xff] }
  0xc7   : > { %v432_v60 = vpop.f32.mrf.mxu2  ;;  %v652_v58 = vpack.c.bf16 %v648_v56, %v648_v56 }
  0xc8   : > { %v439_v61 = vadd.f32 %v432_v60, %v408_v59  ;;  %v454_v6 = vpack.c.bf16 %v452_v62, %v452_v62  ;;  %v653_v59 = vpack.c.bf16 %v649_v57, %v649_v57 }
  0xc9   : > { %v447_v63 = vld [vmem:[#allocation2 + $0x8] sm:$0xff]  ;;  %v656_v60 = vunpack.c.l.bf16 %v652_v58 }
  0xca   : > { %444 = vst.msk [vmem:[#allocation2 + $0x10] sm:$0xff] %vm441_vm1, %v439_v61  ;;  %v449_v1 = vpack.c.bf16 %v447_v63, %v447_v63  ;;  %v456_v13 = vunpack.c.l.bf16 %v454_v6  ;;  %v473_v16 = vunpack.c.l.b16 %v454_v6  ;;  %v657_v61 = vunpack.c.l.bf16 %v653_v59 }
  0xcc   : > { %v451_v3 = vunpack.c.l.bf16 %v449_v1  ;;  %v505_v5 = vunpack.c.l.b16 %v449_v1  ;;  %v458_v21 = vsub.f32 %v452_v62, %v456_v13  ;;  %v715_v62 = vunpack.c.l.b16 %v650_v46 }
  0xcd   : > { %v660_v1 = vsub.f32 %v648_v56, %v656_v60  ;;  %v661_v2 = vsub.f32 %v649_v57, %v657_v61  ;;  %v717_v13 = vunpack.c.l.b16 %v652_v58 }
  0xce   : > { %v506_v8 = vpack.c.b16 %v505_v5, %v504_v4  ;;  %v453_v9 = vsub.f32 %v447_v63, %v451_v3  ;;  %v716_v63 = vunpack.c.l.b16 %v651_v47 }
  0xcf   : > { %v434_v10 = vpop.f32.mrf.mxu2  ;;  %v664_v4 = vpack.c.bf16 %v660_v1, %v660_v1  ;;  %v665_v5 = vpack.c.bf16 %v661_v2, %v661_v2 }
  0xd0   : > { %v440_v11 = vadd.f32 %v434_v10, %v410_v7  ;;  %515 = vmatpush.bf16.msrb.mxu0 %v506_v8  ;;  %v455_v12 = vpack.c.bf16 %v453_v9, %v453_v9  ;;  %v719_v3 = vpack.c.b16 %v716_v63, %v715_v62 }
  0xd1   : > { %v554_v15 = vld [vmem:[#allocation2 + $0x10] sm:$0xff]  ;;  %v682_v6 = vunpack.c.l.b16 %v664_v4  ;;  %v683_v7 = vunpack.c.l.b16 %v665_v5 }
  0xd2   : > { %445 = vst.msk [vmem:[#allocation2 + $0x18] sm:$0xff] %vm441_vm1, %v440_v11  ;;  %v474_v17 = vunpack.c.l.b16 %v455_v12  ;;  %v457_v18 = vunpack.c.l.bf16 %v455_v12  ;;  %v556_v19 = vpack.c.bf16 %v554_v15, %v554_v15 }
  0xd3   : > { %1124 = vmatmul.msk.bf16.vlgmr.msrb.gmra.mxu0 %vm351_vm0, %v1360_v14  ;;  %v685_v8 = vpack.c.b16 %v683_v7, %v682_v6 }
  0xd4   : > { %v475_v20 = vpack.c.b16 %v474_v17, %v473_v16  ;;  %v459_v22 = vsub.f32 %v453_v9, %v457_v18  ;;  %v558_v23 = vunpack.c.l.bf16 %v556_v19  ;;  %v596_v29 = vunpack.c.l.b16 %v556_v19 }
  0xd5   : > { %v666_v9 = vunpack.c.l.bf16 %v662_v52  ;;  %v668_v18 = vunpack.c.l.bf16 %v664_v4  ;;  %v669_v19 = vunpack.c.l.bf16 %v665_v5 }
  0xd6   : > { %490 = vmatpush.bf16.msrb.mxu3 %v475_v20  ;;  %v460_v24 = vpack.c.bf16 %v459_v22, %v458_v21  ;;  %v560_v25 = vsub.f32 %v554_v15, %v558_v23  ;;  %v718_v15 = vunpack.c.l.b16 %v653_v59 }
  0xd7   : > { %v670_v11 = vsub.f32 %v658_v50, %v666_v9  ;;  %v672_v20 = vsub.f32 %v660_v1, %v668_v18  ;;  %v673_v21 = vsub.f32 %v661_v2, %v669_v19 }
  0xd8   : > { %534 = vmatpush.bf16.msrb.mxu1 %v460_v24  ;;  %v562_v31 = vpack.c.bf16 %v560_v25, %v560_v25  ;;  %v720_v17 = vpack.c.b16 %v718_v15, %v717_v13 }
  0xd9   : > { %1122 = vmatmul.msk.bf16.vlgmr.msrb.gmra.mxu3 %vm351_vm0, %v1360_v14  ;;  %v555_v26 = vld [vmem:[#allocation2 + $0x18] sm:$0xff]  ;;  %v675_v22 = vpack.c.bf16 %v673_v21, %v672_v20 }
  0xda   : > { %v557_v27 = vpack.c.bf16 %v555_v26, %v555_v26  ;;  %v564_v35 = vunpack.c.l.bf16 %v562_v31  ;;  %v571_v37 = vunpack.c.l.b16 %v562_v31 }
  0xdb   : > { %1126 = vmatmul.msk.bf16.vlgmr.msrb.gmra.mxu1 %vm351_vm0, %v1360_v14 }
  0xdc   : > { %699 = vmatpush.bf16.msra.mxu1 %v1344_v0  ;;  %v559_v28 = vunpack.c.l.bf16 %v557_v27  ;;  %v597_v30 = vunpack.c.l.b16 %v557_v27  ;;  %v566_v41 = vsub.f32 %v560_v25, %v564_v35 }
  0xde   : > { %v598_v32 = vpack.c.b16 %v597_v30, %v596_v29  ;;  %v561_v33 = vsub.f32 %v555_v26, %v559_v28 }
  0xe0   : > { %607 = vmatpush.bf16.msra.mxu3 %v598_v32  ;;  %v563_v34 = vpack.c.bf16 %v561_v33, %v561_v33 }
  0xe2   : > { %v572_v38 = vunpack.c.l.b16 %v563_v34  ;;  %v565_v39 = vunpack.c.l.bf16 %v563_v34 }
  0xe3   : > { %1125 = vmatmul.msk.bf16.gmra.mxu0 %vm351_vm0, %v1370_v36 }
  0xe4   : > { %759 = vmatpush.bf16.msrb.mxu3 %v1344_v0  ;;  %v573_v40 = vpack.c.b16 %v572_v38, %v571_v37  ;;  %v567_v42 = vsub.f32 %v561_v33, %v565_v39 }
  0xe6   : > { %582 = vmatpush.bf16.msra.mxu2 %v573_v40  ;;  %v568_v43 = vpack.c.bf16 %v567_v42, %v566_v41 }
  0xe8   : > { %626 = vmatpush.bf16.msra.mxu0 %v568_v43 }
  0xe9   : > { %1123 = vmatmul.msk.bf16.gmra.mxu3 %vm351_vm0, %v1370_v36  ;;  %1128 = vmatmul.msk.bf16.vlgmr.msra.gmra.mxu2 %vm351_vm0, %v1360_v14 }
  0xea   : > { %734 = vmatpush.bf16.msrb.mxu2 %v1344_v0  ;;  %v663_v0 = vpack.c.bf16 %v659_v51, %v659_v51 }
  0xeb   : > { %1127 = vmatmul.msk.bf16.gmra.mxu1 %vm351_vm0, %v1370_v36 }
  0xec   : > { %v681_v54 = vunpack.c.l.b16 %v663_v0  ;;  %v667_v10 = vunpack.c.l.bf16 %v663_v0 }
  0xee   : > { %v684_v55 = vpack.c.b16 %v681_v54, %v680_v53  ;;  %v671_v12 = vsub.f32 %v659_v51, %v667_v10 }
  0xf0   : > { %v674_v16 = vpack.c.bf16 %v671_v12, %v670_v11 }
  0xf3   : > { %1132 = vmatmul.msk.bf16.vlgmr.msra.gmra.mxu0 %vm351_vm0, %v1360_v14 }
  0xf9   : > { %1130 = vmatmul.msk.bf16.vlgmr.msra.gmra.mxu3 %vm351_vm0, %v1360_v14  ;;  %1129 = vmatmul.msk.bf16.gmra.mxu2 %vm351_vm0, %v1370_v36 }
  0xfb   : > { %1134 = vmatmul.msk.bf16.vlgmr.msra.gmra.mxu1 %vm351_vm0, %v684_v55 }
 0x103   : > { %1133 = vmatmul.msk.bf16.gmra.mxu0 %vm351_vm0, %v1370_v36 }
 0x109   : > { %1131 = vmatmul.msk.bf16.gmra.mxu3 %vm351_vm0, %v1370_v36  ;;  %1136 = vmatmul.msk.bf16.vlgmr.msrb.gmra.mxu2 %vm351_vm0, %v719_v3 }
 0x10b   : > { %1135 = vmatmul.msk.bf16.gmra.mxu1 %vm351_vm0, %v685_v8 }
 0x119   : > { %1138 = vmatmul.msk.bf16.vlgmr.msrb.gmra.mxu3 %vm351_vm0, %v674_v16  ;;  %1137 = vmatmul.msk.bf16.gmra.mxu2 %vm351_vm0, %v720_v17 }
 0x129   : > { %1139 = vmatmul.msk.bf16.gmra.mxu3 %vm351_vm0, %v675_v22 }
 0x150   : > { %v517_v23 = vpop.f32.mrf.mxu0 }
 0x158   : > { %v536_v24 = vpop.f32.mrf.mxu1  ;;  %v519_v25 = vpop.f32.mrf.mxu0 }
 0x15c   : > { %v492_v26 = vpop.f32.mrf.mxu3 }
 0x15d   : > { %v518_v27 = vadd.f32 %v517_v23, %v492_v26 }
 0x15f   : > { %v546_v28 = vadd.f32 %v536_v24, %v518_v27 }
 0x160   : > { %v538_v29 = vpop.f32.mrf.mxu1  ;;  %v522_v31 = vpop.f32.mrf.mxu0 }
 0x161   : > { %550 = vst.msk [vmem:[%s1412_s21] sm:$0xff] %vm441_vm1, %v546_v28 }
 0x164   : > { %v494_v30 = vpop.f32.mrf.mxu3 }
 0x165   : > { %v520_v32 = vadd.f32 %v519_v25, %v494_v30 }
 0x167   : > { %v547_v33 = vadd.f32 %v538_v29, %v520_v32 }
 0x168   : > { %v541_v34 = vpop.f32.mrf.mxu1  ;;  %v524_v39 = vpop.f32.mrf.mxu0 }
 0x169   : > { %551 = vst.msk [vmem:[%s1412_s21 + $0x8] sm:$0xff] %vm441_vm1, %v547_v33 }
 0x16c   : > { %v497_v35 = vpop.f32.mrf.mxu3  ;;  %v584_v37 = vpop.f32.mrf.mxu2 }
 0x16d   : > { %v523_v38 = vadd.f32 %v522_v31, %v497_v35 }
 0x16f   : > { %v548_v40 = vadd.f32 %v541_v34, %v523_v38 }
 0x170   : > { %v543_v41 = vpop.f32.mrf.mxu1  ;;  %v628_v45 = vpop.f32.mrf.mxu0 }
 0x171   : > { %552 = vst.msk [vmem:[%s1412_s21 + $0x10] sm:$0xff] %vm441_vm1, %v548_v40 }
 0x174   : > { %v499_v42 = vpop.f32.mrf.mxu3  ;;  %v586_v43 = vpop.f32.mrf.mxu2 }
 0x175   : > { %v525_v44 = vadd.f32 %v524_v39, %v499_v42 }
 0x177   : > { %v549_v46 = vadd.f32 %v543_v41, %v525_v44 }
 0x178   : > { %v630_v51 = vpop.f32.mrf.mxu0  ;;  %v701_v59 = vpop.f32.mrf.mxu1 }
 0x179   : > { %553 = vst.msk [vmem:[%s1412_s21 + $0x18] sm:$0xff] %vm441_vm1, %v549_v46 }
 0x17c   : > { %v609_v47 = vpop.f32.mrf.mxu3  ;;  %v589_v49 = vpop.f32.mrf.mxu2 }
 0x17d   : > { %v610_v48 = vadd.f32 %v609_v47, %v584_v37 }
 0x17f   : > { %v638_v50 = vadd.f32 %v628_v45, %v610_v48 }
 0x180   : > { %v633_v55 = vpop.f32.mrf.mxu0  ;;  %v703_v3 = vpop.f32.mrf.mxu1 }
 0x181   : > { %642 = vst.msk [vmem:[%s1412_s21 + $0x20] sm:$0xff] %vm441_vm1, %v638_v50 }
 0x184   : > { %v611_v52 = vpop.f32.mrf.mxu3  ;;  %v591_v54 = vpop.f32.mrf.mxu2 }
 0x185   : > { %v612_v0 = vadd.f32 %v611_v52, %v586_v43 }
 0x187   : > { %v639_v53 = vadd.f32 %v630_v51, %v612_v0 }
 0x188   : > { %v635_v62 = vpop.f32.mrf.mxu0  ;;  %v706_v8 = vpop.f32.mrf.mxu1 }
 0x189   : > { %643 = vst.msk [vmem:[%s1412_s21 + $0x28] sm:$0xff] %vm441_vm1, %v639_v53 }
 0x18c   : > { %v614_v56 = vpop.f32.mrf.mxu3  ;;  %v736_v60 = vpop.f32.mrf.mxu2 }
 0x18d   : > { %v615_v57 = vadd.f32 %v614_v56, %v589_v49  ;;  %v737_v2 = vadd.f32 %v736_v60, %v701_v59 }
 0x18f   : > { %v640_v58 = vadd.f32 %v633_v55, %v615_v57 }
 0x190   : > { %v708_v19 = vpop.f32.mrf.mxu1 }
 0x191   : > { %644 = vst.msk [vmem:[%s1412_s21 + $0x30] sm:$0xff] %vm441_vm1, %v640_v58 }
 0x194   : > { %v616_v61 = vpop.f32.mrf.mxu3  ;;  %v738_v4 = vpop.f32.mrf.mxu2 }
 0x195   : > { %v617_v63 = vadd.f32 %v616_v61, %v591_v54  ;;  %v739_v7 = vadd.f32 %v738_v4, %v703_v3 }
 0x197   : > { %v641_v1 = vadd.f32 %v635_v62, %v617_v63 }
 0x199   : > { %645 = vst.msk [vmem:[%s1412_s21 + $0x38] sm:$0xff] %vm441_vm1, %v641_v1 }
 0x19c   : > { %v761_v5 = vpop.f32.mrf.mxu3  ;;  %v741_v9 = vpop.f32.mrf.mxu2 }
 0x19d   : > { %v771_v6 = vadd.f32 %v761_v5, %v737_v2  ;;  %v742_v15 = vadd.f32 %v741_v9, %v706_v8 }
 0x19f   : > { %775 = vst.msk [vmem:[#allocation2] sm:$0xff] %vm441_vm1, %v771_v6 }
 0x1a4   : > { %v763_v10 = vpop.f32.mrf.mxu3  ;;  %v743_v20 = vpop.f32.mrf.mxu2 }
 0x1a5   : > { %v772_v11 = vadd.f32 %v763_v10, %v739_v7  ;;  %v744_v24 = vadd.f32 %v743_v20, %v708_v19 }
 0x1a6   : > { %v779_v12 = vld [vmem:[#allocation2] sm:$0xff] }
 0x1a7   : > { %776 = vst.msk [vmem:[#allocation2 + $0x8] sm:$0xff] %vm441_vm1, %v772_v11  ;;  %v781_v13 = vpack.c.bf16 %v779_v12, %v779_v12 }
 0x1a9   : > { %v783_v16 = vunpack.c.l.bf16 %v781_v13  ;;  %v821_v26 = vunpack.c.l.b16 %v781_v13 }
 0x1ab   : > { %v785_v21 = vsub.f32 %v779_v12, %v783_v16 }
 0x1ac   : > { %v766_v17 = vpop.f32.mrf.mxu3 }
 0x1ad   : > { %v773_v18 = vadd.f32 %v766_v17, %v742_v15  ;;  %v787_v28 = vpack.c.bf16 %v785_v21, %v785_v21 }
 0x1ae   : > { %v780_v22 = vld [vmem:[#allocation2 + $0x8] sm:$0xff] }
 0x1af   : > { %777 = vst.msk [vmem:[#allocation2 + $0x10] sm:$0xff] %vm441_vm1, %v773_v18  ;;  %v782_v23 = vpack.c.bf16 %v780_v22, %v780_v22  ;;  %v789_v34 = vunpack.c.l.bf16 %v787_v28  ;;  %v796_v37 = vunpack.c.l.b16 %v787_v28 }
 0x1b1   : > { %v784_v25 = vunpack.c.l.bf16 %v782_v23  ;;  %v822_v27 = vunpack.c.l.b16 %v782_v23  ;;  %v791_v42 = vsub.f32 %v785_v21, %v789_v34 }
 0x1b3   : > { %v823_v29 = vpack.c.b16 %v822_v27, %v821_v26  ;;  %v786_v30 = vsub.f32 %v780_v22, %v784_v25 }
 0x1b4   : > { %v768_v31 = vpop.f32.mrf.mxu3 }
 0x1b5   : > { %v774_v32 = vadd.f32 %v768_v31, %v744_v24  ;;  %832 = vmatpush.bf16.msrb.mxu1 %v823_v29  ;;  %v788_v33 = vpack.c.bf16 %v786_v30, %v786_v30 }
 0x1b6   : > { %v871_v35 = vld [vmem:[#allocation2 + $0x10] sm:$0xff] }
 0x1b7   : > { %778 = vst.msk [vmem:[#allocation2 + $0x18] sm:$0xff] %vm441_vm1, %v774_v32  ;;  %v797_v38 = vunpack.c.l.b16 %v788_v33  ;;  %v790_v39 = vunpack.c.l.bf16 %v788_v33  ;;  %v873_v40 = vpack.c.bf16 %v871_v35, %v871_v35 }
 0x1b8   : > { %1142 = vmatmul.msk.bf16.vlgmr.msrb.gmra.mxu1 %vm351_vm0, %v1360_v14 }
 0x1b9   : > { %v798_v41 = vpack.c.b16 %v797_v38, %v796_v37  ;;  %v792_v43 = vsub.f32 %v786_v30, %v790_v39  ;;  %v875_v44 = vunpack.c.l.bf16 %v873_v40  ;;  %v913_v49 = vunpack.c.l.b16 %v873_v40 }
 0x1bb   : > { %807 = vmatpush.bf16.msrb.mxu0 %v798_v41  ;;  %v793_v45 = vpack.c.bf16 %v792_v43, %v791_v42  ;;  %v877_v46 = vsub.f32 %v871_v35, %v875_v44 }
 0x1bd   : > { %851 = vmatpush.bf16.msra.mxu2 %v793_v45  ;;  %v879_v52 = vpack.c.bf16 %v877_v46, %v877_v46 }
 0x1be   : > { %v872_v47 = vld [vmem:[#allocation2 + $0x18] sm:$0xff]  ;;  %1140 = vmatmul.msk.bf16.vlgmr.msrb.gmra.mxu0 %vm351_vm0, %v1360_v14 }
 0x1bf   : > { %v874_v48 = vpack.c.bf16 %v872_v47, %v872_v47  ;;  %v881_v55 = vunpack.c.l.bf16 %v879_v52  ;;  %v888_v56 = vunpack.c.l.b16 %v879_v52 }
 0x1c0   : > { %1144 = vmatmul.msk.bf16.vlgmr.msra.gmra.mxu2 %vm351_vm0, %v1360_v14 }
 0x1c1   : > { %v876_v50 = vunpack.c.l.bf16 %v874_v48  ;;  %v914_v51 = vunpack.c.l.b16 %v874_v48  ;;  %v883_v60 = vsub.f32 %v877_v46, %v881_v55 }
 0x1c3   : > { %v915_v0 = vpack.c.b16 %v914_v51, %v913_v49  ;;  %v878_v53 = vsub.f32 %v872_v47, %v876_v50 }
 0x1c5   : > { %924 = vmatpush.bf16.msra.mxu0 %v915_v0  ;;  %v880_v54 = vpack.c.bf16 %v878_v53, %v878_v53 }
 0x1c7   : > { %v889_v57 = vunpack.c.l.b16 %v880_v54  ;;  %v882_v58 = vunpack.c.l.bf16 %v880_v54 }
 0x1c8   : > { %1143 = vmatmul.msk.bf16.gmra.mxu1 %vm351_vm0, %v1370_v36 }
 0x1c9   : > { %v890_v59 = vpack.c.b16 %v889_v57, %v888_v56  ;;  %v884_v61 = vsub.f32 %v878_v53, %v882_v58 }
 0x1cb   : > { %899 = vmatpush.bf16.msra.mxu3 %v890_v59  ;;  %v885_v62 = vpack.c.bf16 %v884_v61, %v883_v60 }
 0x1cd   : > { %943 = vmatpush.bf16.msra.mxu1 %v885_v62 }
 0x1ce   : > { %1141 = vmatmul.msk.bf16.gmra.mxu0 %vm351_vm0, %v1370_v36  ;;  %1146 = vmatmul.msk.bf16.vlgmr.msra.gmra.mxu3 %vm351_vm0, %v1360_v14 }
 0x1d0   : > { %1145 = vmatmul.msk.bf16.gmra.mxu2 %vm351_vm0, %v1370_v36 }
 0x1d8   : > { %1150 = vmatmul.msk.bf16.vlgmr.msra.gmra.mxu1 %vm351_vm0, %v1360_v14 }
 0x1de   : > { %1148 = vmatmul.msk.bf16.vlgmr.msra.gmra.mxu0 %vm351_vm0, %v1360_v14  ;;  %1147 = vmatmul.msk.bf16.gmra.mxu3 %vm351_vm0, %v1370_v36 }
 0x1e8   : > { %1151 = vmatmul.msk.bf16.gmra.mxu1 %vm351_vm0, %v1370_v36 }
 0x1ee   : > { %1149 = vmatmul.msk.bf16.gmra.mxu0 %vm351_vm0, %v1370_v36 }
 0x235   : > { %v834_v63 = vpop.f32.mrf.mxu1 }
 0x23b   : > { %v809_v1 = vpop.f32.mrf.mxu0 }
 0x23c   : > { %v835_v3 = vadd.f32 %v834_v63, %v809_v1 }
 0x23d   : > { %v836_v2 = vpop.f32.mrf.mxu1 }
 0x243   : > { %v853_v14 = vpop.f32.mrf.mxu2  ;;  %v811_v4 = vpop.f32.mrf.mxu0 }
 0x244   : > { %v863_v5 = vadd.f32 %v853_v14, %v835_v3  ;;  %v837_v36 = vadd.f32 %v836_v2, %v811_v4 }
 0x245   : > { %v839_v6 = vpop.f32.mrf.mxu1 }
 0x246   : > { %867 = vst.msk [vmem:[%s1463_s24] sm:$0xff] %vm441_vm1, %v863_v5 }
 0x24b   : > { %v855_v7 = vpop.f32.mrf.mxu2  ;;  %v814_v8 = vpop.f32.mrf.mxu0 }
 0x24c   : > { %v864_v9 = vadd.f32 %v855_v7, %v837_v36  ;;  %v840_v11 = vadd.f32 %v839_v6, %v814_v8 }
 0x24d   : > { %v841_v10 = vpop.f32.mrf.mxu1 }
 0x24e   : > { %868 = vst.msk [vmem:[%s1463_s24 + $0x8] sm:$0xff] %vm441_vm1, %v864_v9 }
 0x251   : > { %v901_v16 = vpop.f32.mrf.mxu3 }
 0x253   : > { %v858_v12 = vpop.f32.mrf.mxu2  ;;  %v816_v13 = vpop.f32.mrf.mxu0 }
 0x254   : > { %v865_v15 = vadd.f32 %v858_v12, %v840_v11  ;;  %v842_v18 = vadd.f32 %v841_v10, %v816_v13 }
 0x255   : > { %v945_v17 = vpop.f32.mrf.mxu1 }
 0x256   : > { %869 = vst.msk [vmem:[%s1463_s24 + $0x10] sm:$0xff] %vm441_vm1, %v865_v15 }
 0x259   : > { %v903_v24 = vpop.f32.mrf.mxu3 }
 0x25b   : > { %v860_v19 = vpop.f32.mrf.mxu2  ;;  %v926_v20 = vpop.f32.mrf.mxu0 }
 0x25c   : > { %v866_v21 = vadd.f32 %v860_v19, %v842_v18  ;;  %v927_v22 = vadd.f32 %v926_v20, %v901_v16 }
 0x25d   : > { %v947_v25 = vpop.f32.mrf.mxu1 }
 0x25e   : > { %870 = vst.msk [vmem:[%s1463_s24 + $0x18] sm:$0xff] %vm441_vm1, %v866_v21  ;;  %v955_v23 = vadd.f32 %v945_v17, %v927_v22 }
 0x260   : > { %959 = vst.msk [vmem:[%s1463_s24 + $0x20] sm:$0xff] %vm441_vm1, %v955_v23 }
 0x261   : > { %v906_v29 = vpop.f32.mrf.mxu3 }
 0x263   : > { %v928_v26 = vpop.f32.mrf.mxu0 }
 0x264   : > { %v929_v27 = vadd.f32 %v928_v26, %v903_v24 }
 0x265   : > { %v950_v31 = vpop.f32.mrf.mxu1 }
 0x266   : > { %v956_v28 = vadd.f32 %v947_v25, %v929_v27 }
 0x268   : > { %960 = vst.msk [vmem:[%s1463_s24 + $0x28] sm:$0xff] %vm441_vm1, %v956_v28 }
 0x269   : > { %v908_v34 = vpop.f32.mrf.mxu3 }
 0x26b   : > { %v931_v30 = vpop.f32.mrf.mxu0 }
 0x26c   : > { %v932_v32 = vadd.f32 %v931_v30, %v906_v29 }
 0x26d   : > { %v952_v38 = vpop.f32.mrf.mxu1 }
 0x26e   : > { %v957_v33 = vadd.f32 %v950_v31, %v932_v32 }
 0x270   : > { %961 = vst.msk [vmem:[%s1463_s24 + $0x30] sm:$0xff] %vm441_vm1, %v957_v33 }
 0x273   : > { %v933_v35 = vpop.f32.mrf.mxu0 }
 0x274   : > { %v934_v37 = vadd.f32 %v933_v35, %v908_v34 }
 0x276   : > { %v958_v39 = vadd.f32 %v952_v38, %v934_v37 }
 0x278   : > { %962 = vst.msk [vmem:[%s1463_s24 + $0x38] sm:$0xff] %vm441_vm1, %v958_v39 }
 0x279 PF: > { %s18_s18 = sadd.s32 1, %s1264_s18  }
 0x27a   : > { %p15_p8 = scmp.ge.s32.totalorder %s18_s18, 6  }
 0x27c   :  { %17 = sbr.rel (!%p15_p8) target bundleno = 2 (0x2), region = 90 }
 0x281   :  { %1002 = vsyncpa [#allocation4], 1 }
 0x282   :  { %1004 = vsyncpa [#allocation4 + $0x1], 1 }
 0x283   :  { %1005 = vsyncpa [#allocation6], 1 }

</bundles_post_ra>
